<compile_context>
chip_gen: v7x
topology: tpu7x:2x2x1
jax: 0.10.0
libtpu: 0.0.40
codegen_flags: <defaults>
</compile_context>

<pallas_src>
import functools
import math

import jax
import jax.numpy as jnp
from jax.experimental import pallas as pl
from jax.experimental.pallas import tpu as pltpu


# ---------------------------------------------------------------------------
# Generation-aware policy
# ---------------------------------------------------------------------------
def _tpu_config():
    kind = ""
    try:
        kind = (getattr(jax.devices()[0], "device_kind", "") or "").lower()
    except Exception:
        pass
    if "v7" in kind:
        # 64 MiB physical VMEM per TC, 2 TCs/chip, fast bf16 VALU/EUP.
        return dict(name="v7x", tile_m=256, vmem_cap=56 << 20,
                    gelu_approx=True, mxu_align=256)
    if "v6" in kind:
        # 128 MiB VMEM, 2x256 MXU -> big tiles, 256 alignment, tanh GELU on EUP.
        return dict(name="v6e", tile_m=512, vmem_cap=100 << 20,
                    gelu_approx=True, mxu_align=256)
    if "v5" in kind:
        # 128 MiB VMEM, 4x128 MXU (already optimal at 128 alignment), slow MXU
        # -> exact erf GELU stays hidden under the matmuls.
        return dict(name="v5e", tile_m=512, vmem_cap=100 << 20,
                    gelu_approx=False, mxu_align=128)
    # Unknown chip: conservative budget.
    return dict(name="unknown", tile_m=256, vmem_cap=56 << 20,
                gelu_approx=False, mxu_align=128)


def _gelu(x, approx):
    if approx:
        # tanh-approximate GELU: tanh runs on the EUP (separate VLIW slot).
        return jax.nn.gelu(x, approximate=True)
    # PyTorch nn.GELU() default = exact erf-based GELU (computed in f32).
    return 0.5 * x * (1.0 + jax.lax.erf(x * (1.0 / math.sqrt(2.0))))


def _round_up(n, m):
    return ((n + m - 1) // m) * m


def _pad2(a, rows, cols):
    # Pad BEFORE any dtype cast so padded columns are exactly zero.
    return jnp.pad(a, ((0, rows - a.shape[0]), (0, cols - a.shape[1])))


# ---------------------------------------------------------------------------
# Kernel
# ---------------------------------------------------------------------------
def ff_kernel(x_ref, w1_ref, b1_ref, w2_ref, b2_ref,
              w3_ref, b3_ref, w4_ref, b4_ref, o_ref, *, approx_gelu):
    cd = w1_ref.dtype                         # MXU compute dtype (bf16 by default)
    x = x_ref[...].astype(cd)                 # f32 -> bf16 cast in VMEM (free VPU work)

    # splat_networks[0]: Linear -> GELU -> (Dropout = identity in eval) -> Linear
    h = jnp.dot(x, w1_ref[...], preferred_element_type=jnp.float32) + b1_ref[...]
    h = _gelu(h, approx_gelu)
    y = jnp.dot(h.astype(cd), w2_ref[...], preferred_element_type=jnp.float32) + b2_ref[...]

    # global_aggregator: Linear -> GELU -> (Dropout = identity) -> Linear
    g = jnp.dot(y.astype(cd), w3_ref[...], preferred_element_type=jnp.float32) + b3_ref[...]
    g = _gelu(g, approx_gelu)
    o = jnp.dot(g.astype(cd), w4_ref[...], preferred_element_type=jnp.float32) + b4_ref[...]

    o_ref[...] = o.astype(o_ref.dtype)


# ---------------------------------------------------------------------------
# Parameter preparation (pad + cast once, off the per-call hot path)
# ---------------------------------------------------------------------------
def prepare_params(params, *, compute_dtype=jnp.bfloat16, config=None):
    """Pads feature dims to lane-dense multiples and casts weights to the MXU dtype.

    params: (W1,b1,W2,b2,W3,b3,W4,b4); weights stored (in_features, out_features),
    i.e. transposed vs. torch's (out, in). Call this ONCE and reuse the result.
    """
    cfg = config or _tpu_config()
    w1, b1, w2, b2, w3, b3, w4, b4 = params
    D, H = w1.shape

    # 128-lane alignment always; bump to 256 on v6e/v7x when the extra padding
    # is small (<15%) so the 2x256 MXU's last pass isn't half-empty.
    def align(n):
        n128 = _round_up(n, 128)
        if cfg["mxu_align"] == 256:
            n256 = _round_up(n, 256)
            if n256 <= 1.15 * n128:
                return n256
        return n128

    Dp, Hp = align(D), align(H)
    cd = jnp.dtype(compute_dtype)

    # Zero padding is exact: padded hidden/output columns stay 0 through GELU
    # and are sliced off at the end. Pad happens before the cast.
    w1p = _pad2(w1, Dp, Hp).astype(cd); b1p = _pad2(b1, 1, Hp).astype(jnp.float32)
    w2p = _pad2(w2, Hp, Dp).astype(cd); b2p = _pad2(b2, 1, Dp).astype(jnp.float32)
    w3p = _pad2(w3, Dp, Dp).astype(cd); b3p = _pad2(b3, 1, Dp).astype(jnp.float32)
    w4p = _pad2(w4, Dp, Dp).astype(cd); b4p = _pad2(b4, 1, Dp).astype(jnp.float32)

    weights = tuple(jax.block_until_ready(a) for a in
                    (w1p, b1p, w2p, b2p, w3p, b3p, w4p, b4p))
    return dict(weights=weights, D=D, H=H, Dp=Dp, Hp=Hp,
                compute_dtype=cd, config=cfg)


# ---------------------------------------------------------------------------
# Forward (fallback path of SplatAwareFeedForward, eval mode)
# ---------------------------------------------------------------------------
def splat_aware_ff_fallback(x, prepared, *, tile_m=None, out_dtype=None):
    """x: [B, S, D] float32. prepared: output of prepare_params()."""
    B, S, D = x.shape
    M = B * S
    cfg = prepared["config"]
    Dp, Hp = prepared["Dp"], prepared["Hp"]
    cd = prepared["compute_dtype"]
    w1p, b1p, w2p, b2p, w3p, b3p, w4p, b4p = prepared["weights"]
    assert D == prepared["D"], "x feature dim does not match prepared params"
    out_dtype = jnp.dtype(out_dtype or x.dtype)

    # Token tile: generation-aware default, clamped to the workload, and split
    # into >=2 grid steps whenever possible so megacore (v7x: 2 TCs) can shard
    # the "parallel" token axis.
    tile_m = tile_m or cfg["tile_m"]
    tile_m = max(16, _round_up(min(tile_m, M), 16))
    if M >= 32:
        tile_m = min(tile_m, _round_up(-(-M // 2), 16))
    Mp = _round_up(M, tile_m)

    # x stays f32 here; padding only if shapes are not already tile-aligned.
    x2 = x.reshape(M, D)
    if Mp != M or Dp != D:
        x2 = jnp.pad(x2, ((0, Mp - M), (0, Dp - D)))

    # Weights/biases: constant index map -> single resident VMEM copy.
    def resident(shape):
        return pl.BlockSpec(shape, lambda i: (0, 0), pipeline_mode=pl.Buffered(1))

    # VMEM budget: resident weights counted ONCE (Buffered(1)), double-buffered
    # f32 x tile + output tile, f32 intermediates, plus headroom; capped per
    # generation (v5e/v6e: 100 MiB of 128 MiB phys; v7x: 56 MiB of 64 MiB phys).
    weight_bytes = (Dp * Hp + Hp * Dp + 2 * Dp * Dp) * cd.itemsize + (Hp + 3 * Dp) * 4
    io_bytes = 2 * tile_m * Dp * (x.dtype.itemsize + out_dtype.itemsize)
    act_bytes = 6 * tile_m * max(Dp, Hp) * 4
    vmem_limit = int(min(weight_bytes + io_bytes + act_bytes + (16 << 20),
                         cfg["vmem_cap"]))

    cost = pl.CostEstimate(
        flops=2 * Mp * (Dp * Hp + Hp * Dp + 2 * Dp * Dp),
        transcendentals=Mp * (Hp + Dp),
        bytes_accessed=(Mp * Dp * x.dtype.itemsize + Mp * Dp * out_dtype.itemsize
                        + weight_bytes),
    )

    kernel = functools.partial(ff_kernel, approx_gelu=cfg["gelu_approx"])

    out = pl.pallas_call(
        kernel,
        out_shape=jax.ShapeDtypeStruct((Mp, Dp), out_dtype),
        grid_spec=pltpu.PrefetchScalarGridSpec(
            num_scalar_prefetch=0,
            grid=(Mp // tile_m,),
            in_specs=[
                pl.BlockSpec((tile_m, Dp), lambda i: (i, 0)),   # x tile (pipelined, f32)
                resident((Dp, Hp)), resident((1, Hp)),          # W1, b1
                resident((Hp, Dp)), resident((1, Dp)),          # W2, b2
                resident((Dp, Dp)), resident((1, Dp)),          # W3, b3
                resident((Dp, Dp)), resident((1, Dp)),          # W4, b4
            ],
            out_specs=pl.BlockSpec((tile_m, Dp), lambda i: (i, 0)),
        ),
        compiler_params=pltpu.CompilerParams(
            dimension_semantics=("parallel",),
            vmem_limit_bytes=vmem_limit,
        ),
        cost_estimate=cost,
    )(x2, w1p, b1p, w2p, b2p, w3p, b3p, w4p, b4p)

    return out[:M, :D].reshape(B, S, D).astype(x.dtype)


# ---------------------------------------------------------------------------
# Init + reference
# ---------------------------------------------------------------------------
def init_params(key, model_dim, num_splats, ff_dim=None):
    """Deterministic init matching PyTorch nn.Linear shapes (weights stored (in, out))."""
    ff_dim = ff_dim or model_dim * 4
    hidden = ff_dim // num_splats

    def linear(key, fan_in, fan_out):
        k_w, k_b = jax.random.split(key)
        bound = 1.0 / math.sqrt(fan_in)
        w = jax.random.uniform(k_w, (fan_in, fan_out), jnp.float32, -bound, bound)
        b = jax.random.uniform(k_b, (1, fan_out), jnp.float32, -bound, bound)
        return w, b

    k1, k2, k3, k4 = jax.random.split(key, 4)
    w1, b1 = linear(k1, model_dim, hidden)     # splat_networks[0] first Linear
    w2, b2 = linear(k2, hidden, model_dim)     # splat_networks[0] second Linear
    w3, b3 = linear(k3, model_dim, model_dim)  # global_aggregator first Linear
    w4, b4 = linear(k4, model_dim, model_dim)  # global_aggregator second Linear
    return (w1, b1, w2, b2, w3, b3, w4, b4)


def reference_forward(x, params):
    # Exact-erf GELU reference (PyTorch nn.GELU() default), full f32.
    w1, b1, w2, b2, w3, b3, w4, b4 = params
    h = jax.nn.gelu(x @ w1 + b1, approximate=False)
    y = h @ w2 + b2
    g = jax.nn.gelu(y @ w3 + b3, approximate=False)
    return g @ w4 + b4


if __name__ == "__main__":
    model_dim = 32
    num_splats = 4          # ff_dim = 4*model_dim = 128, per-splat hidden = 32
    batch, seq = 2, 8

    key = jax.random.PRNGKey(0)
    k_params, k_x = jax.random.split(key)
    params = init_params(k_params, model_dim, num_splats)
    x = jax.random.normal(k_x, (batch, seq, model_dim), jnp.float32)

    # Pad + cast weights once (off the per-call hot path), then run the kernel.
    prepared = prepare_params(params)
    out = splat_aware_ff_fallback(x, prepared)
    out = jax.block_until_ready(out)

    ref = reference_forward(x, params)
    assert out.shape == (batch, seq, model_dim)
    # bf16 MXU matmuls with f32 accumulation (and tanh-GELU on v6e/v7x) ->
    # relaxed tolerance vs the pure-f32 exact-erf reference.
    assert jnp.allclose(out, ref, atol=5e-2, rtol=5e-2), "mismatch vs pure-JAX reference"

    print("KERNEL_OK")
</pallas_src>

<mosaic_0001>
module attributes {stable_mosaic.version = 11 : i64} {
  func.func @ff_kernel(%arg0: i32, %arg1: memref<16x128xf32, #tpu.memory_space<vmem>>, %arg2: memref<128x128xbf16, #tpu.memory_space<vmem>>, %arg3: memref<1x128xf32, #tpu.memory_space<vmem>>, %arg4: memref<128x128xbf16, #tpu.memory_space<vmem>>, %arg5: memref<1x128xf32, #tpu.memory_space<vmem>>, %arg6: memref<128x128xbf16, #tpu.memory_space<vmem>>, %arg7: memref<1x128xf32, #tpu.memory_space<vmem>>, %arg8: memref<128x128xbf16, #tpu.memory_space<vmem>>, %arg9: memref<1x128xf32, #tpu.memory_space<vmem>>, %arg10: memref<16x128xf32, #tpu.memory_space<vmem>>) attributes {dimension_semantics = [#tpu.dimension_semantics<parallel>], iteration_bounds = array<i64: 1>, scalar_prefetch = 0 : i64, scratch_operands = 0 : i64, tpu.core_type = #tpu.core_type<tc>, window_params = [{transform_indices = @transform_0, window_bounds = array<i64: 16, 128>}, {pipeline_mode = #tpu.pipeline_mode<synchronous>, transform_indices = @transform_1, window_bounds = array<i64: 128, 128>}, {pipeline_mode = #tpu.pipeline_mode<synchronous>, transform_indices = @transform_2, window_bounds = array<i64: 1, 128>}, {pipeline_mode = #tpu.pipeline_mode<synchronous>, transform_indices = @transform_3, window_bounds = array<i64: 128, 128>}, {pipeline_mode = #tpu.pipeline_mode<synchronous>, transform_indices = @transform_4, window_bounds = array<i64: 1, 128>}, {pipeline_mode = #tpu.pipeline_mode<synchronous>, transform_indices = @transform_5, window_bounds = array<i64: 128, 128>}, {pipeline_mode = #tpu.pipeline_mode<synchronous>, transform_indices = @transform_6, window_bounds = array<i64: 1, 128>}, {pipeline_mode = #tpu.pipeline_mode<synchronous>, transform_indices = @transform_7, window_bounds = array<i64: 128, 128>}, {pipeline_mode = #tpu.pipeline_mode<synchronous>, transform_indices = @transform_8, window_bounds = array<i64: 1, 128>}, {transform_indices = @transform_9, window_bounds = array<i64: 16, 128>}]} {
    %c0 = arith.constant 0 : index
    %c0_0 = arith.constant 0 : index
    %0 = vector.load %arg1[%c0, %c0_0] : memref<16x128xf32, #tpu.memory_space<vmem>>, vector<16x128xf32>
    %1 = arith.truncf %0 : vector<16x128xf32> to vector<16x128xbf16>
    %c0_1 = arith.constant 0 : index
    %c0_2 = arith.constant 0 : index
    %2 = vector.load %arg2[%c0_1, %c0_2] : memref<128x128xbf16, #tpu.memory_space<vmem>>, vector<128x128xbf16>
    %cst = arith.constant dense<0.000000e+00> : vector<16x128xf32>
    %3 = tpu.matmul %1, %2, %cst {dimension_numbers = #tpu.dot_dimension_numbers<[1], [0], [0], [1], [0, 0, 1, 1], [], []>} : vector<16x128xbf16>, vector<128x128xbf16>, vector<16x128xf32> -> vector<16x128xf32>
    %c0_3 = arith.constant 0 : index
    %c0_4 = arith.constant 0 : index
    %4 = vector.load %arg3[%c0_3, %c0_4] : memref<1x128xf32, #tpu.memory_space<vmem>>, vector<1x128xf32>
    %5 = vector.broadcast %4 : vector<1x128xf32> to vector<16x128xf32>
    %6 = arith.addf %3, %5 : vector<16x128xf32>
    %cst_5 = arith.constant 5.000000e-01 : f32
    %7 = vector.broadcast %cst_5 : f32 to vector<16x128xf32>
    %8 = arith.mulf %7, %6 : vector<16x128xf32>
    %cst_6 = arith.constant 0.707106769 : f32
    %9 = vector.broadcast %cst_6 : f32 to vector<16x128xf32>
    %10 = arith.mulf %6, %9 : vector<16x128xf32>
    %11 = math.erf %10 : vector<16x128xf32>
    %cst_7 = arith.constant 1.000000e+00 : f32
    %12 = vector.broadcast %cst_7 : f32 to vector<16x128xf32>
    %13 = arith.addf %12, %11 : vector<16x128xf32>
    %14 = arith.mulf %8, %13 : vector<16x128xf32>
    %15 = arith.truncf %14 : vector<16x128xf32> to vector<16x128xbf16>
    %c0_8 = arith.constant 0 : index
    %c0_9 = arith.constant 0 : index
    %16 = vector.load %arg4[%c0_8, %c0_9] : memref<128x128xbf16, #tpu.memory_space<vmem>>, vector<128x128xbf16>
    %cst_10 = arith.constant dense<0.000000e+00> : vector<16x128xf32>
    %17 = tpu.matmul %15, %16, %cst_10 {dimension_numbers = #tpu.dot_dimension_numbers<[1], [0], [0], [1], [0, 0, 1, 1], [], []>} : vector<16x128xbf16>, vector<128x128xbf16>, vector<16x128xf32> -> vector<16x128xf32>
    %c0_11 = arith.constant 0 : index
    %c0_12 = arith.constant 0 : index
    %18 = vector.load %arg5[%c0_11, %c0_12] : memref<1x128xf32, #tpu.memory_space<vmem>>, vector<1x128xf32>
    %19 = vector.broadcast %18 : vector<1x128xf32> to vector<16x128xf32>
    %20 = arith.addf %17, %19 : vector<16x128xf32>
    %21 = arith.truncf %20 : vector<16x128xf32> to vector<16x128xbf16>
    %c0_13 = arith.constant 0 : index
    %c0_14 = arith.constant 0 : index
    %22 = vector.load %arg6[%c0_13, %c0_14] : memref<128x128xbf16, #tpu.memory_space<vmem>>, vector<128x128xbf16>
    %cst_15 = arith.constant dense<0.000000e+00> : vector<16x128xf32>
    %23 = tpu.matmul %21, %22, %cst_15 {dimension_numbers = #tpu.dot_dimension_numbers<[1], [0], [0], [1], [0, 0, 1, 1], [], []>} : vector<16x128xbf16>, vector<128x128xbf16>, vector<16x128xf32> -> vector<16x128xf32>
    %c0_16 = arith.constant 0 : index
    %c0_17 = arith.constant 0 : index
    %24 = vector.load %arg7[%c0_16, %c0_17] : memref<1x128xf32, #tpu.memory_space<vmem>>, vector<1x128xf32>
    %25 = vector.broadcast %24 : vector<1x128xf32> to vector<16x128xf32>
    %26 = arith.addf %23, %25 : vector<16x128xf32>
    %cst_18 = arith.constant 5.000000e-01 : f32
    %27 = vector.broadcast %cst_18 : f32 to vector<16x128xf32>
    %28 = arith.mulf %27, %26 : vector<16x128xf32>
    %cst_19 = arith.constant 0.707106769 : f32
    %29 = vector.broadcast %cst_19 : f32 to vector<16x128xf32>
    %30 = arith.mulf %26, %29 : vector<16x128xf32>
    %31 = math.erf %30 : vector<16x128xf32>
    %cst_20 = arith.constant 1.000000e+00 : f32
    %32 = vector.broadcast %cst_20 : f32 to vector<16x128xf32>
    %33 = arith.addf %32, %31 : vector<16x128xf32>
    %34 = arith.mulf %28, %33 : vector<16x128xf32>
    %35 = arith.truncf %34 : vector<16x128xf32> to vector<16x128xbf16>
    %c0_21 = arith.constant 0 : index
    %c0_22 = arith.constant 0 : index
    %36 = vector.load %arg8[%c0_21, %c0_22] : memref<128x128xbf16, #tpu.memory_space<vmem>>, vector<128x128xbf16>
    %cst_23 = arith.constant dense<0.000000e+00> : vector<16x128xf32>
    %37 = tpu.matmul %35, %36, %cst_23 {dimension_numbers = #tpu.dot_dimension_numbers<[1], [0], [0], [1], [0, 0, 1, 1], [], []>} : vector<16x128xbf16>, vector<128x128xbf16>, vector<16x128xf32> -> vector<16x128xf32>
    %c0_24 = arith.constant 0 : index
    %c0_25 = arith.constant 0 : index
    %38 = vector.load %arg9[%c0_24, %c0_25] : memref<1x128xf32, #tpu.memory_space<vmem>>, vector<1x128xf32>
    %39 = vector.broadcast %38 : vector<1x128xf32> to vector<16x128xf32>
    %40 = arith.addf %37, %39 : vector<16x128xf32>
    %c0_26 = arith.constant 0 : index
    %c0_27 = arith.constant 0 : index
    %41 = vector.load %arg10[%c0_26, %c0_27] : memref<16x128xf32, #tpu.memory_space<vmem>>, vector<16x128xf32>
    tpu.vector_store %arg10[%c0_26, %c0_27], %40 {strides = array<i32>} : memref<16x128xf32, #tpu.memory_space<vmem>>, vector<16x128xf32>,
    return
  }
  func.func @transform_0(%arg0: i32) -> (i32, i32) {
    %c0_i32 = arith.constant 0 : i32
    %c0_i32_0 = arith.constant 0 : i32
    return %arg0, %c0_i32 : i32, i32
  }
  func.func @transform_1(%arg0: i32) -> (i32, i32) {
    %c0_i32 = arith.constant 0 : i32
    %c0_i32_0 = arith.constant 0 : i32
    %c0_i32_1 = arith.constant 0 : i32
    return %c0_i32, %c0_i32_0 : i32, i32
  }
  func.func @transform_2(%arg0: i32) -> (i32, i32) {
    %c0_i32 = arith.constant 0 : i32
    %c0_i32_0 = arith.constant 0 : i32
    %c0_i32_1 = arith.constant 0 : i32
    return %c0_i32, %c0_i32_0 : i32, i32
  }
  func.func @transform_3(%arg0: i32) -> (i32, i32) {
    %c0_i32 = arith.constant 0 : i32
    %c0_i32_0 = arith.constant 0 : i32
    %c0_i32_1 = arith.constant 0 : i32
    return %c0_i32, %c0_i32_0 : i32, i32
  }
  func.func @transform_4(%arg0: i32) -> (i32, i32) {
    %c0_i32 = arith.constant 0 : i32
    %c0_i32_0 = arith.constant 0 : i32
    %c0_i32_1 = arith.constant 0 : i32
    return %c0_i32, %c0_i32_0 : i32, i32
  }
  func.func @transform_5(%arg0: i32) -> (i32, i32) {
    %c0_i32 = arith.constant 0 : i32
    %c0_i32_0 = arith.constant 0 : i32
    %c0_i32_1 = arith.constant 0 : i32
    return %c0_i32, %c0_i32_0 : i32, i32
  }
  func.func @transform_6(%arg0: i32) -> (i32, i32) {
    %c0_i32 = arith.constant 0 : i32
    %c0_i32_0 = arith.constant 0 : i32
    %c0_i32_1 = arith.constant 0 : i32
    return %c0_i32, %c0_i32_0 : i32, i32
  }
  func.func @transform_7(%arg0: i32) -> (i32, i32) {
    %c0_i32 = arith.constant 0 : i32
    %c0_i32_0 = arith.constant 0 : i32
    %c0_i32_1 = arith.constant 0 : i32
    return %c0_i32, %c0_i32_0 : i32, i32
  }
  func.func @transform_8(%arg0: i32) -> (i32, i32) {
    %c0_i32 = arith.constant 0 : i32
    %c0_i32_0 = arith.constant 0 : i32
    %c0_i32_1 = arith.constant 0 : i32
    return %c0_i32, %c0_i32_0 : i32, i32
  }
  func.func @transform_9(%arg0: i32) -> (i32, i32) {
    %c0_i32 = arith.constant 0 : i32
    %c0_i32_0 = arith.constant 0 : i32
    return %arg0, %c0_i32 : i32, i32
  }
}

</mosaic_0001>

<bundles_post_ra>
// kernel: tpu_custom_call.1
= control target key start
LH: loop header
LB: loop body
LE: loop exit
PB: predicated region body
PF: predicated region fallthrough
CT: control target
= control target key end

     0   :  { %14 = vsyncpa [#allocation3], 0  ;;  %s1145_s0 = inlined_call_operand.hbm [shape: f32[16,128], index: 0, kind: input, shape index: {}]   ;;  %s1146_s1 = inlined_call_operand.hbm [shape: bf16[128,128], index: 1, kind: input, shape index: {}]   ;;  %s1147_s2 = inlined_call_operand.vmem [shape: f32[1,128], index: 2, kind: input, shape index: {}]   ;;  %s1148_s3 = inlined_call_operand.hbm [shape: bf16[128,128], index: 3, kind: input, shape index: {}]   ;;  %s1149_s4 = inlined_call_operand.vmem [shape: f32[1,128], index: 4, kind: input, shape index: {}]   ;;  %s1150_s5 = inlined_call_operand.hbm [shape: bf16[128,128], index: 5, kind: input, shape index: {}]   ;;  %s1151_s6 = inlined_call_operand.vmem [shape: f32[1,128], index: 6, kind: input, shape index: {}]   ;;  %s1152_s7 = inlined_call_operand.hbm [shape: bf16[128,128], index: 7, kind: input, shape index: {}]   ;;  %s1153_s8 = inlined_call_operand.vmem [shape: f32[1,128], index: 8, kind: input, shape index: {}]   ;;  %s1154_s9 = inlined_call_operand.hbm [shape: f32[16,128], index: 9, kind: output, shape index: {}]  }
   0x1   :  { %15 = vsyncpa [#allocation6], 0 }
   0x2   :  { %16 = vsyncpa [#allocation9], 0 }
   0x3   :  { %17 = vsyncpa [#allocation4], 0  ;;  %s941_s30 = smov [#allocation5]   ;;  %s801_s13 = scalar_lea.hbm %s1146_s1, 1024 }
   0x4   :  { %s35_s10 = sshll.u32 %s941_s30, 4  ;;  %p802_p0 = scmp.ne.s32.totalorder %s1146_s1, %s801_s13  ;;  %s36_s10 = int_to_ptr.vmem [resolvable:$true] %s35_s10 }
   0x5   :  { %p805_p1 = scmp.lt.u32.totalorder %s801_s13, %s1146_s1 }
   0x7   :  { %p807_p2 = pnand %p805_p1, %p802_p0 }
   0x9   :  { %810 = shalt.err (!%p807_p2)
}
   0xa   :  { %s811_s18 = scalar_lea.vmem %s36_s10, 1024  ;;  %p816_p4 = scmp.lt.s32.totalorder %s36_s10, %s36_s10 }
   0xb   :  { %p812_p3 = scmp.ne.s32.totalorder %s36_s10, %s811_s18  ;;  %p817_p5 = scmp.lt.s32.totalorder %s811_s18, %s811_s18 }
   0xd   :  { %p818_p6 = por %p817_p5, %p816_p4 }
   0xf   :  { %p819_p7 = pnand %p818_p6, %p812_p3 }
  0x11   :  { %822 = shalt.err (!%p819_p7)
}
  0x12   :  { %s942_s19 = smov 64   ;;  %s943_s20 = smov 4  }
  0x13   :  { %41 = dma.hbm_to_vmem [thread:$0]  %s1146_s1, 1024, %s36_s10, [#allocation6], %s942_s19, %s942_s19, %s943_s20  }
  0x14   :  { %s944_s23 = smov [#allocation8]   ;;  %s945_s25 = smov [#allocation2]  }
  0x15   :  { %s63_s24 = sshll.u32 %s944_s23, 4  ;;  %s23_s26 = sshll.u32 %s945_s25, 4  ;;  %s64_s24 = int_to_ptr.vmem [resolvable:$true] %s63_s24  ;;  %s24_s26 = int_to_ptr.vmem [resolvable:$true] %s23_s26 }
  0x16   :  { %s823_s29 = scalar_lea.hbm %s1150_s5, 1024 }
  0x17   :  { %p824_p8 = scmp.ne.s32.totalorder %s1150_s5, %s823_s29  ;;  %p827_p9 = scmp.lt.u32.totalorder %s823_s29, %s1150_s5 }
  0x19   :  { %p829_p10 = pnand %p827_p9, %p824_p8 }
  0x1b   :  { %832 = shalt.err (!%p829_p10)
}
  0x1c   :  { %s833_s1 = scalar_lea.vmem %s64_s24, 1024  ;;  %p838_p12 = scmp.lt.s32.totalorder %s64_s24, %s64_s24 }
  0x1d   :  { %p834_p11 = scmp.ne.s32.totalorder %s64_s24, %s833_s1  ;;  %p839_p13 = scmp.lt.s32.totalorder %s833_s1, %s833_s1 }
  0x1f   :  { %p840_p0 = por %p839_p13, %p838_p12 }
  0x21   :  { %p841_p1 = pnand %p840_p0, %p834_p11 }
  0x23   :  { %844 = shalt.err (!%p841_p1)
}
  0x24   :  { %69 = dma.hbm_to_vmem [thread:$0]  %s1150_s5, 1024, %s64_s24, [#allocation9], %s942_s19, %s942_s19, %s943_s20  }
  0x25   :  { %s845_s17 = scalar_lea.hbm %s1145_s0, 256 }
  0x26   :  { %p846_p2 = scmp.ne.s32.totalorder %s1145_s0, %s845_s17  ;;  %p849_p3 = scmp.lt.u32.totalorder %s845_s17, %s1145_s0 }
  0x28   :  { %p851_p4 = pnand %p849_p3, %p846_p2 }
  0x2a   :  { %854 = shalt.err (!%p851_p4)
}
  0x2b   :  { %s855_s25 = scalar_lea.vmem %s24_s26, 256  ;;  %p860_p6 = scmp.lt.s32.totalorder %s24_s26, %s24_s26 }
  0x2c   :  { %p856_p5 = scmp.ne.s32.totalorder %s24_s26, %s855_s25  ;;  %p861_p7 = scmp.lt.s32.totalorder %s855_s25, %s855_s25 }
  0x2e   :  { %p862_p8 = por %p861_p7, %p860_p6 }
  0x30   :  { %p863_p9 = pnand %p862_p8, %p856_p5 }
  0x32   :  { %866 = shalt.err (!%p863_p9)
}
  0x33   :  { %s946_s5 = smov 128   ;;  %s947_s24 = smov 8  }
  0x34   :  { %29 = dma.hbm_to_vmem [thread:$0]  %s1145_s0, 256, %s24_s26, [#allocation3], %s946_s5, %s946_s5, %s947_s24  }
  0x35   :  { %s948_s29 = smov [#allocation7]   ;;  %s949_s11 = smov [#allocation10]  }
  0x36   :  { %s49_s30 = sshll.u32 %s948_s29, 4  ;;  %s77_s12 = sshll.u32 %s949_s11, 4  ;;  %s50_s30 = int_to_ptr.vmem [resolvable:$true] %s49_s30  ;;  %s78_s12 = int_to_ptr.vmem [resolvable:$true] %s77_s12 }
  0x37   :  { %s867_s10 = scalar_lea.hbm %s1148_s3, 1024 }
  0x38   :  { %p868_p10 = scmp.ne.s32.totalorder %s1148_s3, %s867_s10  ;;  %p871_p11 = scmp.lt.u32.totalorder %s867_s10, %s1148_s3 }
  0x3a   :  { %p873_p12 = pnand %p871_p11, %p868_p10 }
  0x3c   :  { %876 = shalt.err (!%p873_p12)
}
  0x3d   :  { %s877_s0 = scalar_lea.vmem %s50_s30, 1024  ;;  %p882_p0 = scmp.lt.s32.totalorder %s50_s30, %s50_s30 }
  0x3e   :  { %p878_p13 = scmp.ne.s32.totalorder %s50_s30, %s877_s0  ;;  %p883_p1 = scmp.lt.s32.totalorder %s877_s0, %s877_s0 }
  0x40   :  { %p884_p2 = por %p883_p1, %p882_p0 }
  0x42   :  { %p885_p3 = pnand %p884_p2, %p878_p13 }
  0x44   :  { %888 = shalt.err (!%p885_p3)
}
  0x45   :  { %55 = dma.hbm_to_vmem [thread:$0]  %s1148_s3, 1024, %s50_s30, [#allocation6], %s942_s19, %s942_s19, %s943_s20  }
  0x46   :  { %s889_s23 = scalar_lea.hbm %s1152_s7, 1024 }
  0x47   :  { %p890_p4 = scmp.ne.s32.totalorder %s1152_s7, %s889_s23  ;;  %p893_p5 = scmp.lt.u32.totalorder %s889_s23, %s1152_s7 }
  0x49   :  { %p895_p6 = pnand %p893_p5, %p890_p4 }
  0x4b   :  { %898 = shalt.err (!%p895_p6)
}
  0x4c   :  { %s899_s11 = scalar_lea.vmem %s78_s12, 1024  ;;  %p904_p8 = scmp.lt.s32.totalorder %s78_s12, %s78_s12 }
  0x4d   :  { %p900_p7 = scmp.ne.s32.totalorder %s78_s12, %s899_s11  ;;  %p905_p9 = scmp.lt.s32.totalorder %s899_s11, %s899_s11 }
  0x4f   :  { %p906_p10 = por %p905_p9, %p904_p8 }
  0x51   :  { %p907_p11 = pnand %p906_p10, %p900_p7 }
  0x53   :  { %910 = shalt.err (!%p907_p11)
}
  0x54   :  { %83 = dma.hbm_to_vmem [thread:$0]  %s1152_s7, 1024, %s78_s12, [#allocation9], %s942_s19, %s942_s19, %s943_s20  }
  0x55   :  { %933 = dma.done.wait [#allocation3], 256  }
  0x56   :  { %934 = vsyncadd [#allocation3], 4294967040 }
  0x57   :  { %935 = dma.done.wait [#allocation6], 2048  }
  0x58   :  { %936 = vsyncadd [#allocation6], 4294965248 }
  0x59   :  { %937 = dma.done.wait [#allocation9], 2048  }
  0x5a   :  { %938 = vsyncadd [#allocation9], 4294965248  ;;  %v950_v0 = vmov 0.0   ;;  %vm951_vm0 = vmmov 0   ;;  %v761_v1 = vld [vmem:[#allocation5] sm:$0xff]   ;;  %v762_v2 = vld [vmem:[#allocation5 + $0x8] sm:$0xff]  }
  0x5b   :  { %669 = vmatprep.subr.bf16.mxu0 %v950_v0  ;;  %685 = vmatprep.mubr.msk.bf16.mxu0 %vm951_vm0, %v950_v0  ;;  %v763_v3 = vld [vmem:[#allocation5 + $0x10] sm:$0xff]   ;;  %v769_v4 = vld [vmem:[#allocation7] sm:$0xff]   ;;  %v764_v5 = vld [vmem:[#allocation5 + $0x18] sm:$0xff]   ;;  %s952_s1 = smov [#allocation11]  }
  0x5c   :  { %689 = vmatprep.subr.bf16.mxu1 %v950_v0  ;;  %705 = vmatprep.mubr.msk.bf16.mxu1 %vm951_vm0, %v950_v0  ;;  %v770_v6 = vld [vmem:[#allocation7 + $0x8] sm:$0xff]   ;;  %v765_v7 = vld [vmem:[#allocation5 + $0x20] sm:$0xff]   ;;  %v767_v9 = vld [vmem:[#allocation5 + $0x30] sm:$0xff]   ;;  %s583_s10 = sshll.u32 %s952_s1, 4  ;;  %s584_s10 = int_to_ptr.vmem [resolvable:$true] %s583_s10 }
  0x5d   :  { %670 = vmatpush3.bf16.msra.mxu0 %v761_v1  ;;  %690 = vmatpush3.bf16.msra.mxu1 %v769_v4  ;;  %v766_v8 = vld [vmem:[#allocation5 + $0x28] sm:$0xff]   ;;  %v768_v10 = vld [vmem:[#allocation5 + $0x38] sm:$0xff]   ;;  %v102_v11 = vld [vmem:[#allocation2] sm:$0xff]  ;;  %s911_s14 = scalar_lea.vmem %s584_s10, 256  ;;  %p916_p13 = scmp.lt.s32.totalorder %s584_s10, %s584_s10 }
  0x5e   :  { %671 = vmatprep.subr.bf16.mxu0 %v950_v0  ;;  %691 = vmatprep.subr.bf16.mxu1 %v950_v0  ;;  %v103_v12 = vld [vmem:[#allocation2 + $0x8] sm:$0xff]  ;;  %v771_v14 = vld [vmem:[#allocation7 + $0x10] sm:$0xff]   ;;  %v773_v16 = vld [vmem:[#allocation7 + $0x20] sm:$0xff]   ;;  %p912_p12 = scmp.ne.s32.totalorder %s584_s10, %s911_s14  ;;  %p917_p0 = scmp.lt.s32.totalorder %s911_s14, %s911_s14 }
  0x5f   :  { %v104_v13 = vpack.c.bf16 %v103_v12, %v102_v11  ;;  %v772_v15 = vld [vmem:[#allocation7 + $0x18] sm:$0xff]   ;;  %v774_v17 = vld [vmem:[#allocation7 + $0x28] sm:$0xff]   ;;  %v775_v18 = vld [vmem:[#allocation7 + $0x30] sm:$0xff]  }
  0x60   :  { %v776_v19 = vld [vmem:[#allocation7 + $0x38] sm:$0xff]   ;;  %v777_v20 = vld [vmem:[#allocation8] sm:$0xff]   ;;  %v778_v21 = vld [vmem:[#allocation8 + $0x8] sm:$0xff]   ;;  %p918_p1 = por %p917_p0, %p916_p13 }
  0x61   :  { %672 = vmatpush3.bf16.msra.mxu0 %v762_v2  ;;  %692 = vmatpush3.bf16.msra.mxu1 %v770_v6  ;;  %v779_v22 = vld [vmem:[#allocation8 + $0x10] sm:$0xff]   ;;  %v780_v23 = vld [vmem:[#allocation8 + $0x18] sm:$0xff]   ;;  %v781_v24 = vld [vmem:[#allocation8 + $0x20] sm:$0xff]  }
  0x62   :  { %673 = vmatprep.subr.bf16.mxu0 %v950_v0  ;;  %693 = vmatprep.subr.bf16.mxu1 %v950_v0  ;;  %v782_v25 = vld [vmem:[#allocation8 + $0x28] sm:$0xff]   ;;  %v597_v26 = vld [vmem:[%s1147_s2] ss:$0 sm:$0xff]  ;;  %v784_v45 = vld [vmem:[#allocation8 + $0x38] sm:$0xff]   ;;  %p919_p2 = pnand %p918_p1, %p912_p12 }
  0x63   :  { %v783_v44 = vld [vmem:[#allocation8 + $0x30] sm:$0xff]   ;;  %v785_v46 = vld [vmem:[#allocation10] sm:$0xff]   ;;  %v786_v47 = vld [vmem:[#allocation10 + $0x8] sm:$0xff]  }
  0x64   :  { %v606_v48 = vld [vmem:[%s1149_s4] ss:$0 sm:$0xff]  ;;  %v788_v57 = vld [vmem:[#allocation10 + $0x18] sm:$0xff]   ;;  %v789_v58 = vld [vmem:[#allocation10 + $0x20] sm:$0xff]  }
  0x65   :  { %674 = vmatpush3.bf16.msra.mxu0 %v763_v3  ;;  %694 = vmatpush3.bf16.msra.mxu1 %v771_v14  ;;  %v787_v56 = vld [vmem:[#allocation10 + $0x10] sm:$0xff]   ;;  %v790_v59 = vld [vmem:[#allocation10 + $0x28] sm:$0xff]   ;;  %v792_v61 = vld [vmem:[#allocation10 + $0x38] sm:$0xff]  }
  0x66   :  { %675 = vmatprep.subr.bf16.mxu0 %v950_v0  ;;  %695 = vmatprep.subr.bf16.mxu1 %v950_v0  ;;  %v791_v60 = vld [vmem:[#allocation10 + $0x30] sm:$0xff]  }
  0x67   :  { %v615_v62 = vld [vmem:[%s1151_s6] ss:$0 sm:$0xff] }
  0x69   :  { %676 = vmatpush3.bf16.msra.mxu0 %v764_v5  ;;  %696 = vmatpush3.bf16.msra.mxu1 %v772_v15 }
  0x6a   :  { %677 = vmatprep.subr.bf16.mxu0 %v950_v0  ;;  %697 = vmatprep.subr.bf16.mxu1 %v950_v0 }
  0x6d   :  { %678 = vmatpush3.bf16.msra.mxu0 %v765_v7  ;;  %698 = vmatpush3.bf16.msra.mxu1 %v773_v16  ;;  %v624_v16 = vld [vmem:[%s1153_s8] ss:$0 sm:$0xff] }
  0x6e   :  { %679 = vmatprep.subr.bf16.mxu0 %v950_v0  ;;  %699 = vmatprep.subr.bf16.mxu1 %v950_v0 }
  0x71   :  { %680 = vmatpush3.bf16.msra.mxu0 %v766_v8  ;;  %700 = vmatpush3.bf16.msra.mxu1 %v774_v17 }
  0x72   :  { %681 = vmatprep.subr.bf16.mxu0 %v950_v0  ;;  %701 = vmatprep.subr.bf16.mxu1 %v950_v0 }
  0x75   :  { %682 = vmatpush3.bf16.msra.mxu0 %v767_v9  ;;  %702 = vmatpush3.bf16.msra.mxu1 %v775_v18 }
  0x76   :  { %683 = vmatprep.subr.bf16.mxu0 %v950_v0  ;;  %703 = vmatprep.subr.bf16.mxu1 %v950_v0 }
  0x79   :  { %684 = vmatpush3.bf16.msra.mxu0 %v768_v10  ;;  %704 = vmatpush3.bf16.msra.mxu1 %v776_v19 }
  0x7a   :  { %709 = vmatprep.subr.bf16.mxu0 %v950_v0  ;;  %729 = vmatprep.subr.bf16.mxu1 %v950_v0 }
  0x7c   :  { %686 = vmatmul.mubr.bf16.vlgmr.msra.gmra.mrb[0].mxu0 %v104_v13 }
  0x7d   :  { %725 = vmatprep.mubr.msk.bf16.mxu0 %vm951_vm0, %v950_v0  ;;  %710 = vmatpush3.bf16.msra.mxu0 %v777_v20 }
  0x7e   :  { %711 = vmatprep.subr.bf16.mxu0 %v950_v0 }
  0x81   :  { %712 = vmatpush3.bf16.msra.mxu0 %v778_v21 }
  0x82   :  { %713 = vmatprep.subr.bf16.mxu0 %v950_v0 }
  0x85   :  { %714 = vmatpush3.bf16.msra.mxu0 %v779_v22 }
  0x86   :  { %715 = vmatprep.subr.bf16.mxu0 %v950_v0 }
  0x89   :  { %716 = vmatpush3.bf16.msra.mxu0 %v780_v23 }
  0x8a   :  { %717 = vmatprep.subr.bf16.mxu0 %v950_v0 }
  0x8d   :  { %718 = vmatpush3.bf16.msra.mxu0 %v781_v24 }
  0x8e   :  { %719 = vmatprep.subr.bf16.mxu0 %v950_v0 }
  0x91   :  { %720 = vmatpush3.bf16.msra.mxu0 %v782_v25 }
  0x92   :  { %721 = vmatprep.subr.bf16.mxu0 %v950_v0 }
  0x95   :  { %722 = vmatpush3.bf16.msra.mxu0 %v783_v44 }
  0x96   :  { %723 = vmatprep.subr.bf16.mxu0 %v950_v0 }
  0x99   :  { %724 = vmatpush3.bf16.msra.mxu0 %v784_v45 }
 0x14f   :  { %v210_v27 = vpop.f32.mrb[0].mxu0 }
 0x150   :  { %v211_v28 = vadd.f32 %v597_v26, %v210_v27  ;;  %v687_v29 = vpop.f32.mrb[1].mxu0 }
 0x151   :  { %v213_v30 = vpop.f32.mrb[2].mxu0 }
 0x152   :  { %v219_v31 = vmul.f32 0.70710677, %v211_v28  ;;  %v214_v32 = vadd.f32 %v597_v26, %v213_v30  ;;  %v688_v33 = vpop.f32.mrb[3].mxu0  ;;  %v217_v38 = vmul.f32 0.5, %v211_v28 }
 0x154   :  { %793 = verf.f32 %v219_v31  ;;  %v220_v34 = vmul.f32 0.70710677, %v214_v32  ;;  %v218_v39 = vmul.f32 0.5, %v214_v32 }
 0x156   :  { %795 = verf.f32 %v220_v34 }
 0x15e   :  { %v794_v35 = vpop.eup %793 }
 0x15f   :  { %v223_v36 = vadd.f32 1.0, %v794_v35 }
 0x160   :  { %v796_v37 = vpop.eup %795 }
 0x161   :  { %v224_v40 = vadd.f32 1.0, %v796_v37  ;;  %v225_v41 = vmul.f32 %v223_v36, %v217_v38 }
 0x163   :  { %v226_v42 = vmul.f32 %v224_v40, %v218_v39 }
 0x165   :  { %v227_v43 = vpack.c.bf16 %v226_v42, %v225_v41 }
 0x167   :  { %706 = vmatmul.mubr.bf16.vlgmr.msra.gmra.mrb[0].mxu1 %v227_v43 }
 0x168   :  { %745 = vmatprep.mubr.msk.bf16.mxu1 %vm951_vm0, %v950_v0  ;;  %730 = vmatpush3.bf16.msra.mxu1 %v785_v46 }
 0x169   :  { %731 = vmatprep.subr.bf16.mxu1 %v950_v0 }
 0x16c   :  { %732 = vmatpush3.bf16.msra.mxu1 %v786_v47 }
 0x16d   :  { %733 = vmatprep.subr.bf16.mxu1 %v950_v0 }
 0x170   :  { %734 = vmatpush3.bf16.msra.mxu1 %v787_v56 }
 0x171   :  { %735 = vmatprep.subr.bf16.mxu1 %v950_v0 }
 0x174   :  { %736 = vmatpush3.bf16.msra.mxu1 %v788_v57 }
 0x175   :  { %737 = vmatprep.subr.bf16.mxu1 %v950_v0 }
 0x178   :  { %738 = vmatpush3.bf16.msra.mxu1 %v789_v58 }
 0x179   :  { %739 = vmatprep.subr.bf16.mxu1 %v950_v0 }
 0x17c   :  { %740 = vmatpush3.bf16.msra.mxu1 %v790_v59 }
 0x17d   :  { %741 = vmatprep.subr.bf16.mxu1 %v950_v0 }
 0x180   :  { %742 = vmatpush3.bf16.msra.mxu1 %v791_v60 }
 0x181   :  { %743 = vmatprep.subr.bf16.mxu1 %v950_v0 }
 0x184   :  { %744 = vmatpush3.bf16.msra.mxu1 %v792_v61 }
 0x23a   :  { %v333_v49 = vpop.f32.mrb[0].mxu1 }
 0x23b   :  { %v707_v50 = vpop.f32.mrb[1].mxu1  ;;  %v334_v52 = vadd.f32 %v606_v48, %v333_v49 }
 0x23c   :  { %v336_v51 = vpop.f32.mrb[2].mxu1 }
 0x23d   :  { %v337_v53 = vadd.f32 %v606_v48, %v336_v51  ;;  %v708_v54 = vpop.f32.mrb[3].mxu1 }
 0x23f   :  { %v340_v55 = vpack.c.bf16 %v337_v53, %v334_v52 }
 0x241   :  { %726 = vmatmul.mubr.bf16.vlgmr.msra.gmra.mrb[4].mxu0 %v340_v55 }
 0x314   :  { %v446_v63 = vpop.f32.mrb[4].mxu0 }
 0x315   :  { %v447_v1 = vadd.f32 %v615_v62, %v446_v63  ;;  %v727_v2 = vpop.f32.mrb[5].mxu0 }
 0x316   :  { %v449_v3 = vpop.f32.mrb[6].mxu0 }
 0x317   :  { %v455_v4 = vmul.f32 0.70710677, %v447_v1  ;;  %v450_v5 = vadd.f32 %v615_v62, %v449_v3  ;;  %v728_v6 = vpop.f32.mrb[7].mxu0  ;;  %v453_v0 = vmul.f32 0.5, %v447_v1 }
 0x319   :  { %797 = verf.f32 %v455_v4  ;;  %v456_v7 = vmul.f32 0.70710677, %v450_v5  ;;  %v454_v11 = vmul.f32 0.5, %v450_v5 }
 0x31b   :  { %799 = verf.f32 %v456_v7 }
 0x323   :  { %v798_v8 = vpop.eup %797 }
 0x324   :  { %v459_v9 = vadd.f32 1.0, %v798_v8 }
 0x325   :  { %v800_v10 = vpop.eup %799 }
 0x326   :  { %v460_v12 = vadd.f32 1.0, %v800_v10  ;;  %v461_v13 = vmul.f32 %v459_v9, %v453_v0 }
 0x328   :  { %v462_v14 = vmul.f32 %v460_v12, %v454_v11 }
 0x32a   :  { %v463_v15 = vpack.c.bf16 %v462_v14, %v461_v13 }
 0x32c   :  { %746 = vmatmul.mubr.bf16.vlgmr.msra.gmra.mrb[4].mxu1 %v463_v15 }
 0x3ff   :  { %v569_v17 = vpop.f32.mrb[4].mxu1 }
 0x400   :  { %v570_v18 = vadd.f32 %v624_v16, %v569_v17  ;;  %v747_v19 = vpop.f32.mrb[5].mxu1 }
 0x401   :  { %v572_v20 = vpop.f32.mrb[6].mxu1 }
 0x402   :  { %576 = vst [vmem:[#allocation11] sm:$0xff] %v570_v18  ;;  %v573_v21 = vadd.f32 %v624_v16, %v572_v20  ;;  %v748_v22 = vpop.f32.mrb[7].mxu1 }
 0x404   :  { %577 = vst [vmem:[#allocation11 + $0x8] sm:$0xff] %v573_v21 }
 0x405   :  { %922 = shalt.err (!%p919_p2)
}
 0x406   :  { %s923_s16 = scalar_lea.hbm %s1154_s9, 256 }
 0x407   :  { %p924_p3 = scmp.ne.s32.totalorder %s1154_s9, %s923_s16  ;;  %p927_p4 = scmp.lt.u32.totalorder %s923_s16, %s1154_s9 }
 0x409   :  { %p929_p5 = pnand %p927_p4, %p924_p3 }
 0x40b   :  { %932 = shalt.err (!%p929_p5)
}
 0x40c   :  { %589 = dma.vmem_to_hbm [thread:$0]  %s584_s10, 256, %s1154_s9, [#allocation4], %s946_s5, %s946_s5, %s947_s24  }
 0x40d   :  { %939 = dma.done.wait [#allocation4], 256  }
 0x40e   :  { %940 = vsyncadd [#allocation4], 4294967040 }
 0x40f   :  { %593 = vsyncpa [#allocation3], 1 }
 0x410   :  { %594 = vsyncpa [#allocation6], 1 }
 0x411   :  { %595 = vsyncpa [#allocation9], 1 }
 0x412   :  { %596 = vsyncpa [#allocation4], 1 }

</bundles_post_ra>
